<compile_context>
chip_gen: v6e
topology: v6e:2x2x1
jax: 0.10.0
libtpu: 0.0.40
codegen_flags: <defaults>
</compile_context>

<pallas_src>
import functools

import jax
import jax.numpy as jnp
from jax import lax
from jax.experimental import pallas as pl
from jax.experimental.pallas import tpu as pltpu


def conv_bn_fused_kernel(x_ref, w_ref, gamma_ref, beta_ref, y_ref,
                         conv_sc, slab_sc, scale_sc, shift_sc, *,
                         KH, KW, OH, OW, Wp, C_in_p, Mp, count, eps):
    """Fused conv + training-mode BatchNorm.

    Grid = (2, N):
      phase 0 (p==0): im2col slab fill + single fused-K matmul -> conv_sc[n]
      phase 1 (p==1): at n==0 fold batch stats into scale/shift; y = conv*scale+shift

    x_ref     : (1, C_in_p, Lflat)   bf16 flattened padded image (channel-major)
    w_ref     : (C_out, K_total)     bf16 weights, K_total = KH*KW*C_in_p
    gamma_ref : (C_out, 1)           f32
    beta_ref  : (C_out, 1)           f32
    y_ref     : (1, C_out, OH*OW)    f32 normalized output (pixels lane-dense)
    conv_sc   : (N, C_out, OH*OW)    f32 whole-batch conv scratch
    slab_sc   : (K_total, Mp)        bf16 im2col slab, Mp = OH*Wp
    scale_sc  : (C_out, 1)           f32 folded BN scale
    shift_sc  : (C_out, 1)           f32 folded BN shift
    """
    p = pl.program_id(0)   # 0: conv into scratch, 1: normalize + write
    n = pl.program_id(1)   # image index

    @pl.when(p == 0)
    def _conv_phase():
        # im2col slab fill: one contiguous lane-offset slice per tap, no reshapes.
        for kh in range(KH):
            for kw in range(KW):
                t = kh * KW + kw
                off = kh * Wp + kw                      # stride == 1
                slab_sc[t * C_in_p:(t + 1) * C_in_p, :] = x_ref[0, :, off:off + Mp]

        # Single fused-K matmul: (C_out, K) x (K, Mp) -> (C_out, Mp), f32 accumulate.
        conv_full = lax.dot_general(
            w_ref[...], slab_sc[...], (((1,), (0,)), ((), ())),
            preferred_element_type=jnp.float32)

        # Compact the Wp-wide padded rows to their OW valid columns into the scratch
        # (lane-dense (C_out, OH*OW) per image).
        dst = conv_sc.at[n]
        for oh in range(OH):
            dst[:, oh * OW:(oh + 1) * OW] = conv_full[:, oh * Wp:oh * Wp + OW]

    @pl.when(p == 1)
    def _bn_phase():
        @pl.when(n == 0)
        def _fold_stats():
            conv = conv_sc[...]                                       # (N, C_out, M) f32
            mean = (jnp.sum(jnp.sum(conv, axis=0), axis=1, keepdims=True)
                    * (1.0 / count))                                  # (C_out, 1)
            d = conv - mean[None]
            var = (jnp.sum(jnp.sum(d * d, axis=0), axis=1, keepdims=True)
                   * (1.0 / count))                                   # biased, centered
            inv = gamma_ref[...] * lax.rsqrt(var + eps)
            scale_sc[...] = inv
            shift_sc[...] = beta_ref[...] - mean * inv

        # y = conv * scale + shift, full-width lane-dense store.
        y_ref[0] = conv_sc[n] * scale_sc[...] + shift_sc[...]


def conv_bn_forward(x_nchw, w_oihw, conv_b, gamma, beta, *, stride=1, padding=0,
                    eps=1e-5, compute_dtype=jnp.bfloat16,
                    vmem_limit_bytes=32 * 1024 * 1024):
    # BatchNorm is shift-invariant: the conv bias cancels exactly in the normalized
    # output, so it is intentionally not fed to the kernel.
    del conv_b

    if stride != 1:
        # TODO(synk): stride>1 via wrapper-side space-to-depth phase split.
        raise NotImplementedError("conv_bn_forward currently supports stride == 1")

    N, C_in, H, W = x_nchw.shape
    C_out, _, KH, KW = w_oihw.shape
    OH = H + 2 * padding - KH + 1
    OW = W + 2 * padding - KW + 1
    Hp, Wp = H + 2 * padding, W + 2 * padding
    M = OH * OW                      # valid output pixels per image
    Mp = OH * Wp                     # padded output columns fed to the MXU
    C_in_p = ((C_in + 7) // 8) * 8   # sublane-aligned channel count
    K_total = KH * KW * C_in_p
    Lflat = Hp * Wp + KW - 1         # flat length incl. tail pad for garbage columns

    # --- glue (wrapper-side layout only, no im2col materialization) ---
    # channels zero-padded to C_in_p, spatial zero-pad, flatten each channel's padded
    # image, tail-pad, cast to bf16.
    xp = jnp.pad(x_nchw, ((0, 0), (0, C_in_p - C_in),
                          (padding, padding), (padding, padding)))
    x_flat = xp.reshape(N, C_in_p, Hp * Wp)
    x_flat = jnp.pad(x_flat, ((0, 0), (0, 0), (0, Lflat - Hp * Wp)))
    x_flat = x_flat.astype(compute_dtype)

    # weights: (C_out, C_in, KH, KW) -> (C_out, KH, KW, C_in_p) -> (C_out, K_total),
    # row order matches the slab row order (tap-major, channel-minor).
    wpad = jnp.pad(w_oihw, ((0, 0), (0, C_in_p - C_in), (0, 0), (0, 0)))
    w2 = jnp.transpose(wpad, (0, 2, 3, 1)).reshape(C_out, K_total).astype(compute_dtype)

    gamma2 = gamma.astype(jnp.float32).reshape(C_out, 1)
    beta2 = beta.astype(jnp.float32).reshape(C_out, 1)

    kernel = functools.partial(
        conv_bn_fused_kernel, KH=KH, KW=KW, OH=OH, OW=OW, Wp=Wp,
        C_in_p=C_in_p, Mp=Mp, count=float(N * M), eps=float(eps))

    y = pl.pallas_call(
        kernel,
        out_shape=jax.ShapeDtypeStruct((N, C_out, M), jnp.float32),
        grid_spec=pltpu.PrefetchScalarGridSpec(
            num_scalar_prefetch=0,
            grid=(2, N),   # phase-major: all convs first, then all BN applies
            in_specs=[
                # image n in phase 0; parked on block 0 (unused) during phase 1
                pl.BlockSpec((1, C_in_p, Lflat), lambda p, n: (n * (1 - p), 0, 0)),
                pl.BlockSpec((C_out, K_total), lambda p, n: (0, 0)),
                pl.BlockSpec((C_out, 1), lambda p, n: (0, 0)),
                pl.BlockSpec((C_out, 1), lambda p, n: (0, 0)),
            ],
            # Output block stays parked on image 0 through phase 0 (never written,
            # never flushed), then advances with n in phase 1: each image's output is
            # written to VMEM once and DMA'd to HBM exactly once.
            out_specs=pl.BlockSpec((1, C_out, M), lambda p, n: (n * p, 0, 0)),
            scratch_shapes=[
                pltpu.VMEM((N, C_out, M), jnp.float32),      # whole-batch conv output
                pltpu.VMEM((K_total, Mp), compute_dtype),    # im2col slab
                pltpu.VMEM((C_out, 1), jnp.float32),         # folded BN scale
                pltpu.VMEM((C_out, 1), jnp.float32),         # folded BN shift
            ]),
        compiler_params=pltpu.CompilerParams(
            dimension_semantics=("arbitrary", "arbitrary"),
            vmem_limit_bytes=vmem_limit_bytes),
    )(x_flat, w2, gamma2, beta2)

    # (N, C_out, OH*OW) is already NCHW-ordered: free reshape, no transpose back.
    return y.reshape(N, C_out, OH, OW)


if __name__ == "__main__":
    # Conv_bn(in_planes=4, planes=8, kernel_size=3, stride=1, padding=1, bias=True)
    N, C_in, H, W = 2, 4, 16, 16
    C_out, KH, KW = 8, 3, 3
    stride, padding, eps = 1, 1, 1e-5

    key = jax.random.PRNGKey(0)
    k1, k2, k3, k4, k5 = jax.random.split(key, 5)
    x = jax.random.normal(k1, (N, C_in, H, W), jnp.float32)
    w = 0.1 * jax.random.normal(k2, (C_out, C_in, KH, KW), jnp.float32)
    b = 0.1 * jax.random.normal(k3, (C_out,), jnp.float32)
    gamma = 1.0 + 0.1 * jax.random.normal(k4, (C_out,), jnp.float32)
    beta = 0.1 * jax.random.normal(k5, (C_out,), jnp.float32)

    out = conv_bn_forward(x, w, b, gamma, beta, stride=stride,
                          padding=padding, eps=eps)
    out = jax.block_until_ready(out)

    # Reference: conv (+ bias) + training-mode BN (biased variance).  The reference
    # conv uses the same bf16-quantized operands the kernel feeds the MXU (f32
    # accumulation), so the comparison isolates kernel correctness from the deliberate
    # bf16-input performance choice.  The bias is included to confirm it cancels.
    xq = x.astype(jnp.bfloat16).astype(jnp.float32)
    wq = w.astype(jnp.bfloat16).astype(jnp.float32)
    conv_ref = lax.conv_general_dilated(
        xq, wq, (stride, stride), ((padding, padding), (padding, padding)),
        dimension_numbers=("NCHW", "OIHW", "NCHW")) + b[None, :, None, None]
    mean = conv_ref.mean(axis=(0, 2, 3), keepdims=True)
    var = conv_ref.var(axis=(0, 2, 3), keepdims=True)
    ref = (gamma[None, :, None, None] * (conv_ref - mean)
           / jnp.sqrt(var + eps) + beta[None, :, None, None])

    assert out.shape == (N, C_out, H, W)
    assert jnp.allclose(out, ref, rtol=1e-3, atol=1e-3), "mismatch vs reference"
    print("KERNEL_OK")
</pallas_src>

<mosaic_0001>
module attributes {stable_mosaic.version = 11 : i64} {
  func.func @conv_bn_fused_kernel(%arg0: i32, %arg1: i32, %arg2: memref<1x8x326xbf16, #tpu.memory_space<vmem>>, %arg3: memref<8x72xbf16, #tpu.memory_space<vmem>>, %arg4: memref<8x1xf32, #tpu.memory_space<vmem>>, %arg5: memref<8x1xf32, #tpu.memory_space<vmem>>, %arg6: memref<1x8x256xf32, #tpu.memory_space<vmem>>, %arg7: memref<2x8x256xf32, #tpu.memory_space<vmem>>, %arg8: memref<72x288xbf16, #tpu.memory_space<vmem>>, %arg9: memref<8x1xf32, #tpu.memory_space<vmem>>, %arg10: memref<8x1xf32, #tpu.memory_space<vmem>>) attributes {dimension_semantics = [#tpu.dimension_semantics<arbitrary>, #tpu.dimension_semantics<arbitrary>], iteration_bounds = array<i64: 2, 2>, scalar_prefetch = 0 : i64, scratch_operands = 4 : i64, tpu.core_type = #tpu.core_type<tc>, window_params = [{transform_indices = @transform_0, window_bounds = array<i64: 1, 8, 326>}, {pipeline_mode = #tpu.pipeline_mode<synchronous>, transform_indices = @transform_1, window_bounds = array<i64: 8, 72>}, {pipeline_mode = #tpu.pipeline_mode<synchronous>, transform_indices = @transform_2, window_bounds = array<i64: 8, 1>}, {pipeline_mode = #tpu.pipeline_mode<synchronous>, transform_indices = @transform_3, window_bounds = array<i64: 8, 1>}, {transform_indices = @transform_4, window_bounds = array<i64: 1, 8, 256>}]} {
    %c0_i32 = arith.constant 0 : i32
    %0 = arith.cmpi eq, %arg0, %c0_i32 : i32
    %1 = arith.extui %0 : i1 to i32
    %c0_i32_0 = arith.constant 0 : i32
    %2 = arith.cmpi ne, %1, %c0_i32_0 : i32
    scf.if %2 {
      %c0 = arith.constant 0 : index
      %c0_2 = arith.constant 0 : index
      %c0_3 = arith.constant 0 : index
      %6 = vector.load %arg2[%c0, %c0_2, %c0_3] : memref<1x8x326xbf16, #tpu.memory_space<vmem>>, vector<1x8x288xbf16>
      %7 = vector.shape_cast %6 : vector<1x8x288xbf16> to vector<8x288xbf16>
      %c0_4 = arith.constant 0 : index
      %c0_5 = arith.constant 0 : index
      %8 = vector.load %arg8[%c0_4, %c0_5] : memref<72x288xbf16, #tpu.memory_space<vmem>>, vector<8x288xbf16>
      tpu.vector_store %arg8[%c0_4, %c0_5], %7 {strides = array<i32>} : memref<72x288xbf16, #tpu.memory_space<vmem>>, vector<8x288xbf16>,
      %c0_6 = arith.constant 0 : index
      %c0_7 = arith.constant 0 : index
      %c1 = arith.constant 1 : index
      %9 = vector.load %arg2[%c0_6, %c0_7, %c1] : memref<1x8x326xbf16, #tpu.memory_space<vmem>>, vector<1x8x288xbf16>
      %10 = vector.shape_cast %9 : vector<1x8x288xbf16> to vector<8x288xbf16>
      %c8 = arith.constant 8 : index
      %c0_8 = arith.constant 0 : index
      %11 = vector.load %arg8[%c8, %c0_8] : memref<72x288xbf16, #tpu.memory_space<vmem>>, vector<8x288xbf16>
      tpu.vector_store %arg8[%c8, %c0_8], %10 {strides = array<i32>} : memref<72x288xbf16, #tpu.memory_space<vmem>>, vector<8x288xbf16>,
      %c0_9 = arith.constant 0 : index
      %c0_10 = arith.constant 0 : index
      %c2 = arith.constant 2 : index
      %12 = vector.load %arg2[%c0_9, %c0_10, %c2] : memref<1x8x326xbf16, #tpu.memory_space<vmem>>, vector<1x8x288xbf16>
      %13 = vector.shape_cast %12 : vector<1x8x288xbf16> to vector<8x288xbf16>
      %c16 = arith.constant 16 : index
      %c0_11 = arith.constant 0 : index
      %14 = vector.load %arg8[%c16, %c0_11] : memref<72x288xbf16, #tpu.memory_space<vmem>>, vector<8x288xbf16>
      tpu.vector_store %arg8[%c16, %c0_11], %13 {strides = array<i32>} : memref<72x288xbf16, #tpu.memory_space<vmem>>, vector<8x288xbf16>,
      %c0_12 = arith.constant 0 : index
      %c0_13 = arith.constant 0 : index
      %c18 = arith.constant 18 : index
      %15 = vector.load %arg2[%c0_12, %c0_13, %c18] : memref<1x8x326xbf16, #tpu.memory_space<vmem>>, vector<1x8x288xbf16>
      %16 = vector.shape_cast %15 : vector<1x8x288xbf16> to vector<8x288xbf16>
      %c24 = arith.constant 24 : index
      %c0_14 = arith.constant 0 : index
      %17 = vector.load %arg8[%c24, %c0_14] : memref<72x288xbf16, #tpu.memory_space<vmem>>, vector<8x288xbf16>
      tpu.vector_store %arg8[%c24, %c0_14], %16 {strides = array<i32>} : memref<72x288xbf16, #tpu.memory_space<vmem>>, vector<8x288xbf16>,
      %c0_15 = arith.constant 0 : index
      %c0_16 = arith.constant 0 : index
      %c19 = arith.constant 19 : index
      %18 = vector.load %arg2[%c0_15, %c0_16, %c19] : memref<1x8x326xbf16, #tpu.memory_space<vmem>>, vector<1x8x288xbf16>
      %19 = vector.shape_cast %18 : vector<1x8x288xbf16> to vector<8x288xbf16>
      %c32 = arith.constant 32 : index
      %c0_17 = arith.constant 0 : index
      %20 = vector.load %arg8[%c32, %c0_17] : memref<72x288xbf16, #tpu.memory_space<vmem>>, vector<8x288xbf16>
      tpu.vector_store %arg8[%c32, %c0_17], %19 {strides = array<i32>} : memref<72x288xbf16, #tpu.memory_space<vmem>>, vector<8x288xbf16>,
      %c0_18 = arith.constant 0 : index
      %c0_19 = arith.constant 0 : index
      %c20 = arith.constant 20 : index
      %21 = vector.load %arg2[%c0_18, %c0_19, %c20] : memref<1x8x326xbf16, #tpu.memory_space<vmem>>, vector<1x8x288xbf16>
      %22 = vector.shape_cast %21 : vector<1x8x288xbf16> to vector<8x288xbf16>
      %c40 = arith.constant 40 : index
      %c0_20 = arith.constant 0 : index
      %23 = vector.load %arg8[%c40, %c0_20] : memref<72x288xbf16, #tpu.memory_space<vmem>>, vector<8x288xbf16>
      tpu.vector_store %arg8[%c40, %c0_20], %22 {strides = array<i32>} : memref<72x288xbf16, #tpu.memory_space<vmem>>, vector<8x288xbf16>,
      %c0_21 = arith.constant 0 : index
      %c0_22 = arith.constant 0 : index
      %c36 = arith.constant 36 : index
      %24 = vector.load %arg2[%c0_21, %c0_22, %c36] : memref<1x8x326xbf16, #tpu.memory_space<vmem>>, vector<1x8x288xbf16>
      %25 = vector.shape_cast %24 : vector<1x8x288xbf16> to vector<8x288xbf16>
      %c48 = arith.constant 48 : index
      %c0_23 = arith.constant 0 : index
      %26 = vector.load %arg8[%c48, %c0_23] : memref<72x288xbf16, #tpu.memory_space<vmem>>, vector<8x288xbf16>
      tpu.vector_store %arg8[%c48, %c0_23], %25 {strides = array<i32>} : memref<72x288xbf16, #tpu.memory_space<vmem>>, vector<8x288xbf16>,
      %c0_24 = arith.constant 0 : index
      %c0_25 = arith.constant 0 : index
      %c37 = arith.constant 37 : index
      %27 = vector.load %arg2[%c0_24, %c0_25, %c37] : memref<1x8x326xbf16, #tpu.memory_space<vmem>>, vector<1x8x288xbf16>
      %28 = vector.shape_cast %27 : vector<1x8x288xbf16> to vector<8x288xbf16>
      %c56 = arith.constant 56 : index
      %c0_26 = arith.constant 0 : index
      %29 = vector.load %arg8[%c56, %c0_26] : memref<72x288xbf16, #tpu.memory_space<vmem>>, vector<8x288xbf16>
      tpu.vector_store %arg8[%c56, %c0_26], %28 {strides = array<i32>} : memref<72x288xbf16, #tpu.memory_space<vmem>>, vector<8x288xbf16>,
      %c0_27 = arith.constant 0 : index
      %c0_28 = arith.constant 0 : index
      %c38 = arith.constant 38 : index
      %30 = vector.load %arg2[%c0_27, %c0_28, %c38] : memref<1x8x326xbf16, #tpu.memory_space<vmem>>, vector<1x8x288xbf16>
      %31 = vector.shape_cast %30 : vector<1x8x288xbf16> to vector<8x288xbf16>
      %c64 = arith.constant 64 : index
      %c0_29 = arith.constant 0 : index
      %32 = vector.load %arg8[%c64, %c0_29] : memref<72x288xbf16, #tpu.memory_space<vmem>>, vector<8x288xbf16>
      tpu.vector_store %arg8[%c64, %c0_29], %31 {strides = array<i32>} : memref<72x288xbf16, #tpu.memory_space<vmem>>, vector<8x288xbf16>,
      %c0_30 = arith.constant 0 : index
      %c0_31 = arith.constant 0 : index
      %33 = vector.load %arg3[%c0_30, %c0_31] : memref<8x72xbf16, #tpu.memory_space<vmem>>, vector<8x72xbf16>
      %c0_32 = arith.constant 0 : index
      %c0_33 = arith.constant 0 : index
      %34 = vector.load %arg8[%c0_32, %c0_33] : memref<72x288xbf16, #tpu.memory_space<vmem>>, vector<72x288xbf16>
      %cst = arith.constant dense<0.000000e+00> : vector<8x288xf32>
      %35 = tpu.matmul %33, %34, %cst {dimension_numbers = #tpu.dot_dimension_numbers<[1], [0], [0], [1], [0, 0, 1, 1], [], []>} : vector<8x72xbf16>, vector<72x288xbf16>, vector<8x288xf32> -> vector<8x288xf32>
      %36 = vector.extract_strided_slice %35 {offsets = [0, 0], sizes = [8, 16], strides = [1, 1]} : vector<8x288xf32> to vector<8x16xf32>
      %c0_i32_34 = arith.constant 0 : i32
      %c0_i32_35 = arith.constant 0 : i32
      %37 = tpu.memref_slice %arg7[%arg1, %c0_i32_34, %c0_i32_35] : memref<2x8x256xf32, #tpu.memory_space<vmem>> -> memref<1x8x256xf32, #tpu.memory_space<vmem>>
      %38 = tpu.memref_squeeze %37 : memref<1x8x256xf32, #tpu.memory_space<vmem>> -> memref<8x256xf32, #tpu.memory_space<vmem>>
      %c0_36 = arith.constant 0 : index
      %c0_37 = arith.constant 0 : index
      %39 = vector.load %38[%c0_36, %c0_37] : memref<8x256xf32, #tpu.memory_space<vmem>>, vector<8x16xf32>
      tpu.vector_store %38[%c0_36, %c0_37], %36 {strides = array<i32>} : memref<8x256xf32, #tpu.memory_space<vmem>>, vector<8x16xf32>,
      %40 = vector.extract_strided_slice %35 {offsets = [0, 18], sizes = [8, 16], strides = [1, 1]} : vector<8x288xf32> to vector<8x16xf32>
      %c0_i32_38 = arith.constant 0 : i32
      %c0_i32_39 = arith.constant 0 : i32
      %41 = tpu.memref_slice %arg7[%arg1, %c0_i32_38, %c0_i32_39] : memref<2x8x256xf32, #tpu.memory_space<vmem>> -> memref<1x8x256xf32, #tpu.memory_space<vmem>>
      %42 = tpu.memref_squeeze %41 : memref<1x8x256xf32, #tpu.memory_space<vmem>> -> memref<8x256xf32, #tpu.memory_space<vmem>>
      %c0_40 = arith.constant 0 : index
      %c16_41 = arith.constant 16 : index
      %43 = vector.load %42[%c0_40, %c16_41] : memref<8x256xf32, #tpu.memory_space<vmem>>, vector<8x16xf32>
      tpu.vector_store %42[%c0_40, %c16_41], %40 {strides = array<i32>} : memref<8x256xf32, #tpu.memory_space<vmem>>, vector<8x16xf32>,
      %44 = vector.extract_strided_slice %35 {offsets = [0, 36], sizes = [8, 16], strides = [1, 1]} : vector<8x288xf32> to vector<8x16xf32>
      %c0_i32_42 = arith.constant 0 : i32
      %c0_i32_43 = arith.constant 0 : i32
      %45 = tpu.memref_slice %arg7[%arg1, %c0_i32_42, %c0_i32_43] : memref<2x8x256xf32, #tpu.memory_space<vmem>> -> memref<1x8x256xf32, #tpu.memory_space<vmem>>
      %46 = tpu.memref_squeeze %45 : memref<1x8x256xf32, #tpu.memory_space<vmem>> -> memref<8x256xf32, #tpu.memory_space<vmem>>
      %c0_44 = arith.constant 0 : index
      %c32_45 = arith.constant 32 : index
      %47 = vector.load %46[%c0_44, %c32_45] : memref<8x256xf32, #tpu.memory_space<vmem>>, vector<8x16xf32>
      tpu.vector_store %46[%c0_44, %c32_45], %44 {strides = array<i32>} : memref<8x256xf32, #tpu.memory_space<vmem>>, vector<8x16xf32>,
      %48 = vector.extract_strided_slice %35 {offsets = [0, 54], sizes = [8, 16], strides = [1, 1]} : vector<8x288xf32> to vector<8x16xf32>
      %c0_i32_46 = arith.constant 0 : i32
      %c0_i32_47 = arith.constant 0 : i32
      %49 = tpu.memref_slice %arg7[%arg1, %c0_i32_46, %c0_i32_47] : memref<2x8x256xf32, #tpu.memory_space<vmem>> -> memref<1x8x256xf32, #tpu.memory_space<vmem>>
      %50 = tpu.memref_squeeze %49 : memref<1x8x256xf32, #tpu.memory_space<vmem>> -> memref<8x256xf32, #tpu.memory_space<vmem>>
      %c0_48 = arith.constant 0 : index
      %c48_49 = arith.constant 48 : index
      %51 = vector.load %50[%c0_48, %c48_49] : memref<8x256xf32, #tpu.memory_space<vmem>>, vector<8x16xf32>
      tpu.vector_store %50[%c0_48, %c48_49], %48 {strides = array<i32>} : memref<8x256xf32, #tpu.memory_space<vmem>>, vector<8x16xf32>,
      %52 = vector.extract_strided_slice %35 {offsets = [0, 72], sizes = [8, 16], strides = [1, 1]} : vector<8x288xf32> to vector<8x16xf32>
      %c0_i32_50 = arith.constant 0 : i32
      %c0_i32_51 = arith.constant 0 : i32
      %53 = tpu.memref_slice %arg7[%arg1, %c0_i32_50, %c0_i32_51] : memref<2x8x256xf32, #tpu.memory_space<vmem>> -> memref<1x8x256xf32, #tpu.memory_space<vmem>>
      %54 = tpu.memref_squeeze %53 : memref<1x8x256xf32, #tpu.memory_space<vmem>> -> memref<8x256xf32, #tpu.memory_space<vmem>>
      %c0_52 = arith.constant 0 : index
      %c64_53 = arith.constant 64 : index
      %55 = vector.load %54[%c0_52, %c64_53] : memref<8x256xf32, #tpu.memory_space<vmem>>, vector<8x16xf32>
      tpu.vector_store %54[%c0_52, %c64_53], %52 {strides = array<i32>} : memref<8x256xf32, #tpu.memory_space<vmem>>, vector<8x16xf32>,
      %56 = vector.extract_strided_slice %35 {offsets = [0, 90], sizes = [8, 16], strides = [1, 1]} : vector<8x288xf32> to vector<8x16xf32>
      %c0_i32_54 = arith.constant 0 : i32
      %c0_i32_55 = arith.constant 0 : i32
      %57 = tpu.memref_slice %arg7[%arg1, %c0_i32_54, %c0_i32_55] : memref<2x8x256xf32, #tpu.memory_space<vmem>> -> memref<1x8x256xf32, #tpu.memory_space<vmem>>
      %58 = tpu.memref_squeeze %57 : memref<1x8x256xf32, #tpu.memory_space<vmem>> -> memref<8x256xf32, #tpu.memory_space<vmem>>
      %c0_56 = arith.constant 0 : index
      %c80 = arith.constant 80 : index
      %59 = vector.load %58[%c0_56, %c80] : memref<8x256xf32, #tpu.memory_space<vmem>>, vector<8x16xf32>
      tpu.vector_store %58[%c0_56, %c80], %56 {strides = array<i32>} : memref<8x256xf32, #tpu.memory_space<vmem>>, vector<8x16xf32>,
      %60 = vector.extract_strided_slice %35 {offsets = [0, 108], sizes = [8, 16], strides = [1, 1]} : vector<8x288xf32> to vector<8x16xf32>
      %c0_i32_57 = arith.constant 0 : i32
      %c0_i32_58 = arith.constant 0 : i32
      %61 = tpu.memref_slice %arg7[%arg1, %c0_i32_57, %c0_i32_58] : memref<2x8x256xf32, #tpu.memory_space<vmem>> -> memref<1x8x256xf32, #tpu.memory_space<vmem>>
      %62 = tpu.memref_squeeze %61 : memref<1x8x256xf32, #tpu.memory_space<vmem>> -> memref<8x256xf32, #tpu.memory_space<vmem>>
      %c0_59 = arith.constant 0 : index
      %c96 = arith.constant 96 : index
      %63 = vector.load %62[%c0_59, %c96] : memref<8x256xf32, #tpu.memory_space<vmem>>, vector<8x16xf32>
      tpu.vector_store %62[%c0_59, %c96], %60 {strides = array<i32>} : memref<8x256xf32, #tpu.memory_space<vmem>>, vector<8x16xf32>,
      %64 = vector.extract_strided_slice %35 {offsets = [0, 126], sizes = [8, 16], strides = [1, 1]} : vector<8x288xf32> to vector<8x16xf32>
      %c0_i32_60 = arith.constant 0 : i32
      %c0_i32_61 = arith.constant 0 : i32
      %65 = tpu.memref_slice %arg7[%arg1, %c0_i32_60, %c0_i32_61] : memref<2x8x256xf32, #tpu.memory_space<vmem>> -> memref<1x8x256xf32, #tpu.memory_space<vmem>>
      %66 = tpu.memref_squeeze %65 : memref<1x8x256xf32, #tpu.memory_space<vmem>> -> memref<8x256xf32, #tpu.memory_space<vmem>>
      %c0_62 = arith.constant 0 : index
      %c112 = arith.constant 112 : index
      %67 = vector.load %66[%c0_62, %c112] : memref<8x256xf32, #tpu.memory_space<vmem>>, vector<8x16xf32>
      tpu.vector_store %66[%c0_62, %c112], %64 {strides = array<i32>} : memref<8x256xf32, #tpu.memory_space<vmem>>, vector<8x16xf32>,
      %68 = vector.extract_strided_slice %35 {offsets = [0, 144], sizes = [8, 16], strides = [1, 1]} : vector<8x288xf32> to vector<8x16xf32>
      %c0_i32_63 = arith.constant 0 : i32
      %c0_i32_64 = arith.constant 0 : i32
      %69 = tpu.memref_slice %arg7[%arg1, %c0_i32_63, %c0_i32_64] : memref<2x8x256xf32, #tpu.memory_space<vmem>> -> memref<1x8x256xf32, #tpu.memory_space<vmem>>
      %70 = tpu.memref_squeeze %69 : memref<1x8x256xf32, #tpu.memory_space<vmem>> -> memref<8x256xf32, #tpu.memory_space<vmem>>
      %c0_65 = arith.constant 0 : index
      %c128 = arith.constant 128 : index
      %71 = vector.load %70[%c0_65, %c128] : memref<8x256xf32, #tpu.memory_space<vmem>>, vector<8x16xf32>
      tpu.vector_store %70[%c0_65, %c128], %68 {strides = array<i32>} : memref<8x256xf32, #tpu.memory_space<vmem>>, vector<8x16xf32>,
      %72 = vector.extract_strided_slice %35 {offsets = [0, 162], sizes = [8, 16], strides = [1, 1]} : vector<8x288xf32> to vector<8x16xf32>
      %c0_i32_66 = arith.constant 0 : i32
      %c0_i32_67 = arith.constant 0 : i32
      %73 = tpu.memref_slice %arg7[%arg1, %c0_i32_66, %c0_i32_67] : memref<2x8x256xf32, #tpu.memory_space<vmem>> -> memref<1x8x256xf32, #tpu.memory_space<vmem>>
      %74 = tpu.memref_squeeze %73 : memref<1x8x256xf32, #tpu.memory_space<vmem>> -> memref<8x256xf32, #tpu.memory_space<vmem>>
      %c0_68 = arith.constant 0 : index
      %c144 = arith.constant 144 : index
      %75 = vector.load %74[%c0_68, %c144] : memref<8x256xf32, #tpu.memory_space<vmem>>, vector<8x16xf32>
      tpu.vector_store %74[%c0_68, %c144], %72 {strides = array<i32>} : memref<8x256xf32, #tpu.memory_space<vmem>>, vector<8x16xf32>,
      %76 = vector.extract_strided_slice %35 {offsets = [0, 180], sizes = [8, 16], strides = [1, 1]} : vector<8x288xf32> to vector<8x16xf32>
      %c0_i32_69 = arith.constant 0 : i32
      %c0_i32_70 = arith.constant 0 : i32
      %77 = tpu.memref_slice %arg7[%arg1, %c0_i32_69, %c0_i32_70] : memref<2x8x256xf32, #tpu.memory_space<vmem>> -> memref<1x8x256xf32, #tpu.memory_space<vmem>>
      %78 = tpu.memref_squeeze %77 : memref<1x8x256xf32, #tpu.memory_space<vmem>> -> memref<8x256xf32, #tpu.memory_space<vmem>>
      %c0_71 = arith.constant 0 : index
      %c160 = arith.constant 160 : index
      %79 = vector.load %78[%c0_71, %c160] : memref<8x256xf32, #tpu.memory_space<vmem>>, vector<8x16xf32>
      tpu.vector_store %78[%c0_71, %c160], %76 {strides = array<i32>} : memref<8x256xf32, #tpu.memory_space<vmem>>, vector<8x16xf32>,
      %80 = vector.extract_strided_slice %35 {offsets = [0, 198], sizes = [8, 16], strides = [1, 1]} : vector<8x288xf32> to vector<8x16xf32>
      %c0_i32_72 = arith.constant 0 : i32
      %c0_i32_73 = arith.constant 0 : i32
      %81 = tpu.memref_slice %arg7[%arg1, %c0_i32_72, %c0_i32_73] : memref<2x8x256xf32, #tpu.memory_space<vmem>> -> memref<1x8x256xf32, #tpu.memory_space<vmem>>
      %82 = tpu.memref_squeeze %81 : memref<1x8x256xf32, #tpu.memory_space<vmem>> -> memref<8x256xf32, #tpu.memory_space<vmem>>
      %c0_74 = arith.constant 0 : index
      %c176 = arith.constant 176 : index
      %83 = vector.load %82[%c0_74, %c176] : memref<8x256xf32, #tpu.memory_space<vmem>>, vector<8x16xf32>
      tpu.vector_store %82[%c0_74, %c176], %80 {strides = array<i32>} : memref<8x256xf32, #tpu.memory_space<vmem>>, vector<8x16xf32>,
      %84 = vector.extract_strided_slice %35 {offsets = [0, 216], sizes = [8, 16], strides = [1, 1]} : vector<8x288xf32> to vector<8x16xf32>
      %c0_i32_75 = arith.constant 0 : i32
      %c0_i32_76 = arith.constant 0 : i32
      %85 = tpu.memref_slice %arg7[%arg1, %c0_i32_75, %c0_i32_76] : memref<2x8x256xf32, #tpu.memory_space<vmem>> -> memref<1x8x256xf32, #tpu.memory_space<vmem>>
      %86 = tpu.memref_squeeze %85 : memref<1x8x256xf32, #tpu.memory_space<vmem>> -> memref<8x256xf32, #tpu.memory_space<vmem>>
      %c0_77 = arith.constant 0 : index
      %c192 = arith.constant 192 : index
      %87 = vector.load %86[%c0_77, %c192] : memref<8x256xf32, #tpu.memory_space<vmem>>, vector<8x16xf32>
      tpu.vector_store %86[%c0_77, %c192], %84 {strides = array<i32>} : memref<8x256xf32, #tpu.memory_space<vmem>>, vector<8x16xf32>,
      %88 = vector.extract_strided_slice %35 {offsets = [0, 234], sizes = [8, 16], strides = [1, 1]} : vector<8x288xf32> to vector<8x16xf32>
      %c0_i32_78 = arith.constant 0 : i32
      %c0_i32_79 = arith.constant 0 : i32
      %89 = tpu.memref_slice %arg7[%arg1, %c0_i32_78, %c0_i32_79] : memref<2x8x256xf32, #tpu.memory_space<vmem>> -> memref<1x8x256xf32, #tpu.memory_space<vmem>>
      %90 = tpu.memref_squeeze %89 : memref<1x8x256xf32, #tpu.memory_space<vmem>> -> memref<8x256xf32, #tpu.memory_space<vmem>>
      %c0_80 = arith.constant 0 : index
      %c208 = arith.constant 208 : index
      %91 = vector.load %90[%c0_80, %c208] : memref<8x256xf32, #tpu.memory_space<vmem>>, vector<8x16xf32>
      tpu.vector_store %90[%c0_80, %c208], %88 {strides = array<i32>} : memref<8x256xf32, #tpu.memory_space<vmem>>, vector<8x16xf32>,
      %92 = vector.extract_strided_slice %35 {offsets = [0, 252], sizes = [8, 16], strides = [1, 1]} : vector<8x288xf32> to vector<8x16xf32>
      %c0_i32_81 = arith.constant 0 : i32
      %c0_i32_82 = arith.constant 0 : i32
      %93 = tpu.memref_slice %arg7[%arg1, %c0_i32_81, %c0_i32_82] : memref<2x8x256xf32, #tpu.memory_space<vmem>> -> memref<1x8x256xf32, #tpu.memory_space<vmem>>
      %94 = tpu.memref_squeeze %93 : memref<1x8x256xf32, #tpu.memory_space<vmem>> -> memref<8x256xf32, #tpu.memory_space<vmem>>
      %c0_83 = arith.constant 0 : index
      %c224 = arith.constant 224 : index
      %95 = vector.load %94[%c0_83, %c224] : memref<8x256xf32, #tpu.memory_space<vmem>>, vector<8x16xf32>
      tpu.vector_store %94[%c0_83, %c224], %92 {strides = array<i32>} : memref<8x256xf32, #tpu.memory_space<vmem>>, vector<8x16xf32>,
      %96 = vector.extract_strided_slice %35 {offsets = [0, 270], sizes = [8, 16], strides = [1, 1]} : vector<8x288xf32> to vector<8x16xf32>
      %c0_i32_84 = arith.constant 0 : i32
      %c0_i32_85 = arith.constant 0 : i32
      %97 = tpu.memref_slice %arg7[%arg1, %c0_i32_84, %c0_i32_85] : memref<2x8x256xf32, #tpu.memory_space<vmem>> -> memref<1x8x256xf32, #tpu.memory_space<vmem>>
      %98 = tpu.memref_squeeze %97 : memref<1x8x256xf32, #tpu.memory_space<vmem>> -> memref<8x256xf32, #tpu.memory_space<vmem>>
      %c0_86 = arith.constant 0 : index
      %c240 = arith.constant 240 : index
      %99 = vector.load %98[%c0_86, %c240] : memref<8x256xf32, #tpu.memory_space<vmem>>, vector<8x16xf32>
      tpu.vector_store %98[%c0_86, %c240], %96 {strides = array<i32>} : memref<8x256xf32, #tpu.memory_space<vmem>>, vector<8x16xf32>,
    } else {
    }
    %c1_i32 = arith.constant 1 : i32
    %3 = arith.cmpi eq, %arg0, %c1_i32 : i32
    %4 = arith.extui %3 : i1 to i32
    %c0_i32_1 = arith.constant 0 : i32
    %5 = arith.cmpi ne, %4, %c0_i32_1 : i32
    scf.if %5 {
      %c0_i32_2 = arith.constant 0 : i32
      %6 = arith.cmpi eq, %arg1, %c0_i32_2 : i32
      %7 = arith.extui %6 : i1 to i32
      %c0_i32_3 = arith.constant 0 : i32
      %8 = arith.cmpi ne, %7, %c0_i32_3 : i32
      scf.if %8 {
        %c0_12 = arith.constant 0 : index
        %c0_13 = arith.constant 0 : index
        %c0_14 = arith.constant 0 : index
        %21 = vector.load %arg7[%c0_12, %c0_13, %c0_14] : memref<2x8x256xf32, #tpu.memory_space<vmem>>, vector<2x8x256xf32>
        %cst = arith.constant dense<0.000000e+00> : vector<8x256xf32>
        %22 = vector.multi_reduction <add>, %21, %cst [0] : vector<2x8x256xf32> to vector<8x256xf32>
        %cst_15 = arith.constant dense<0.000000e+00> : vector<8xf32>
        %23 = vector.multi_reduction <add>, %22, %cst_15 [1] : vector<8x256xf32> to vector<8xf32>
        %24 = vector.shape_cast %23 : vector<8xf32> to vector<8x1xf32>
        %cst_16 = arith.constant 0.001953125 : f32
        %25 = vector.broadcast %cst_16 : f32 to vector<8x1xf32>
        %26 = arith.mulf %24, %25 : vector<8x1xf32>
        %27 = vector.shape_cast %26 : vector<8x1xf32> to vector<1x8x1xf32>
        %28 = vector.broadcast %27 : vector<1x8x1xf32> to vector<2x8x256xf32>
        %29 = arith.subf %21, %28 : vector<2x8x256xf32>
        %30 = arith.mulf %29, %29 : vector<2x8x256xf32>
        %cst_17 = arith.constant dense<0.000000e+00> : vector<8x256xf32>
        %31 = vector.multi_reduction <add>, %30, %cst_17 [0] : vector<2x8x256xf32> to vector<8x256xf32>
        %cst_18 = arith.constant dense<0.000000e+00> : vector<8xf32>
        %32 = vector.multi_reduction <add>, %31, %cst_18 [1] : vector<8x256xf32> to vector<8xf32>
        %33 = vector.shape_cast %32 : vector<8xf32> to vector<8x1xf32>
        %cst_19 = arith.constant 0.001953125 : f32
        %34 = vector.broadcast %cst_19 : f32 to vector<8x1xf32>
        %35 = arith.mulf %33, %34 : vector<8x1xf32>
        %c0_20 = arith.constant 0 : index
        %c0_21 = arith.constant 0 : index
        %36 = vector.load %arg4[%c0_20, %c0_21] : memref<8x1xf32, #tpu.memory_space<vmem>>, vector<8x1xf32>
        %cst_22 = arith.constant 9.99999974E-6 : f32
        %37 = vector.broadcast %cst_22 : f32 to vector<8x1xf32>
        %38 = arith.addf %35, %37 : vector<8x1xf32>
        %39 = math.rsqrt %38 : vector<8x1xf32>
        %40 = arith.mulf %36, %39 : vector<8x1xf32>
        %c0_23 = arith.constant 0 : index
        %c0_24 = arith.constant 0 : index
        %41 = vector.load %arg9[%c0_23, %c0_24] : memref<8x1xf32, #tpu.memory_space<vmem>>, vector<8x1xf32>
        tpu.vector_store %arg9[%c0_23, %c0_24], %40 {strides = array<i32>} : memref<8x1xf32, #tpu.memory_space<vmem>>, vector<8x1xf32>,
        %c0_25 = arith.constant 0 : index
        %c0_26 = arith.constant 0 : index
        %42 = vector.load %arg5[%c0_25, %c0_26] : memref<8x1xf32, #tpu.memory_space<vmem>>, vector<8x1xf32>
        %43 = arith.mulf %26, %40 : vector<8x1xf32>
        %44 = arith.subf %42, %43 : vector<8x1xf32>
        %c0_27 = arith.constant 0 : index
        %c0_28 = arith.constant 0 : index
        %45 = vector.load %arg10[%c0_27, %c0_28] : memref<8x1xf32, #tpu.memory_space<vmem>>, vector<8x1xf32>
        tpu.vector_store %arg10[%c0_27, %c0_28], %44 {strides = array<i32>} : memref<8x1xf32, #tpu.memory_space<vmem>>, vector<8x1xf32>,
      } else {
      }
      %9 = arith.index_cast %arg1 : i32 to index
      %c0 = arith.constant 0 : index
      %c0_4 = arith.constant 0 : index
      %10 = vector.load %arg7[%9, %c0, %c0_4] : memref<2x8x256xf32, #tpu.memory_space<vmem>>, vector<1x8x256xf32>
      %11 = vector.shape_cast %10 : vector<1x8x256xf32> to vector<8x256xf32>
      %c0_5 = arith.constant 0 : index
      %c0_6 = arith.constant 0 : index
      %12 = vector.load %arg9[%c0_5, %c0_6] : memref<8x1xf32, #tpu.memory_space<vmem>>, vector<8x1xf32>
      %13 = vector.broadcast %12 : vector<8x1xf32> to vector<8x256xf32>
      %14 = arith.mulf %11, %13 : vector<8x256xf32>
      %c0_7 = arith.constant 0 : index
      %c0_8 = arith.constant 0 : index
      %15 = vector.load %arg10[%c0_7, %c0_8] : memref<8x1xf32, #tpu.memory_space<vmem>>, vector<8x1xf32>
      %16 = vector.broadcast %15 : vector<8x1xf32> to vector<8x256xf32>
      %17 = arith.addf %14, %16 : vector<8x256xf32>
      %c0_9 = arith.constant 0 : index
      %c0_10 = arith.constant 0 : index
      %c0_11 = arith.constant 0 : index
      %18 = vector.load %arg6[%c0_9, %c0_10, %c0_11] : memref<1x8x256xf32, #tpu.memory_space<vmem>>, vector<1x8x256xf32>
      %19 = vector.shape_cast %18 : vector<1x8x256xf32> to vector<8x256xf32>
      %20 = vector.shape_cast %17 : vector<8x256xf32> to vector<1x8x256xf32>
      tpu.vector_store %arg6[%c0_9, %c0_10, %c0_11], %20 {strides = array<i32>} : memref<1x8x256xf32, #tpu.memory_space<vmem>>, vector<1x8x256xf32>,
    } else {
    }
    return
  }
  func.func @transform_0(%arg0: i32, %arg1: i32) -> (i32, i32, i32) {
    %c1_i32 = arith.constant 1 : i32
    %0 = arith.subi %c1_i32, %arg0 : i32
    %1 = arith.muli %arg1, %0 : i32
    %c0_i32 = arith.constant 0 : i32
    %c0_i32_0 = arith.constant 0 : i32
    %c0_i32_1 = arith.constant 0 : i32
    return %1, %c0_i32, %c0_i32_0 : i32, i32, i32
  }
  func.func @transform_1(%arg0: i32, %arg1: i32) -> (i32, i32) {
    %c0_i32 = arith.constant 0 : i32
    %c0_i32_0 = arith.constant 0 : i32
    %c0_i32_1 = arith.constant 0 : i32
    return %c0_i32, %c0_i32_0 : i32, i32
  }
  func.func @transform_2(%arg0: i32, %arg1: i32) -> (i32, i32) {
    %c0_i32 = arith.constant 0 : i32
    %c0_i32_0 = arith.constant 0 : i32
    %c0_i32_1 = arith.constant 0 : i32
    return %c0_i32, %c0_i32_0 : i32, i32
  }
  func.func @transform_3(%arg0: i32, %arg1: i32) -> (i32, i32) {
    %c0_i32 = arith.constant 0 : i32
    %c0_i32_0 = arith.constant 0 : i32
    %c0_i32_1 = arith.constant 0 : i32
    return %c0_i32, %c0_i32_0 : i32, i32
  }
  func.func @transform_4(%arg0: i32, %arg1: i32) -> (i32, i32, i32) {
    %0 = arith.muli %arg1, %arg0 : i32
    %c0_i32 = arith.constant 0 : i32
    %c0_i32_0 = arith.constant 0 : i32
    %c0_i32_1 = arith.constant 0 : i32
    return %0, %c0_i32, %c0_i32_0 : i32, i32, i32
  }
}

</mosaic_0001>

<bundles_post_ra>
// kernel: tpu_custom_call.1
= control target key start
LH: loop header
LB: loop body
LE: loop exit
PB: predicated region body
PF: predicated region fallthrough
CT: control target
= control target key end

     0   :  { %9 = vsyncpa [#allocation7], 0  ;;  %s1521_s0 = inlined_call_operand.hbm [shape: bf16[2,8,326], index: 0, kind: input, shape index: {}]   ;;  %s1522_s1 = inlined_call_operand.vmem [shape: bf16[8,72], index: 1, kind: input, shape index: {}]   ;;  %s1523_s2 = inlined_call_operand.vmem [shape: f32[8,1], index: 2, kind: input, shape index: {}]   ;;  %s1524_s3 = inlined_call_operand.vmem [shape: f32[8,1], index: 3, kind: input, shape index: {}]   ;;  %s1525_s4 = inlined_call_operand.hbm [shape: f32[2,8,256], index: 4, kind: output, shape index: {}]  }
   0x1   :  { %11 = vsyncpa [#allocation7 + $0x1], 0 }
   0x2   :  { %12 = vsyncpa [#allocation8], 0 }
   0x3   :  { %14 = vsyncpa [#allocation8 + $0x1], 0  ;;  %s1217_s15 = smov 0   ;;  %s1219_s16 = smov 0  }
   0x4   :  { %s1221_s17 = smov 0   ;;  %s1223_s18 = smov 0  }
   0x5   :  { %s1225_s19 = smov 0   ;;  %s1227_s20 = smov 0  }
   0x6   :  { %s1229_s21 = smov 0   ;;  %s1231_s22 = smov 0  }
   0x7   :  { %s1233_s23 = smov 0   ;;  %s1235_s24 = smov 0  }
   0x8   :  { %s1237_s25 = smov 0  }
   0x9 LB: > { %1530 = sst [smem:[#allocation12_spill]] %s1156_s23  ;;  %s819_s26 = sadd.s32 4294967295, %s1164_s25   ;;  %s1164_s25 = sphi %s1237_s25, %s20_s25   ;;  %s1160_s24 = sphi %s1235_s24, %s1553_s24   ;;  %s1156_s23 = sphi %s1233_s23, %s1545_s23   ;;  %s1152_s22 = sphi %s1231_s22, %s1544_s22   ;;  %s1148_s21 = sphi %s1229_s21, %s1543_s21   ;;  %s1144_s20 = sphi %s1227_s20, %s1552_s20   ;;  %s1140_s19 = sphi %s1225_s19, %s1551_s19   ;;  %s1136_s18 = sphi %s1223_s18, %s1550_s18   ;;  %s1132_s17 = sphi %s1221_s17, %s1549_s17   ;;  %s1128_s16 = sphi %s1219_s16, %s1548_s16   ;;  %s1124_s15 = sphi %s1217_s15, %s1547_s15  }
   0xa   : > { %1531 = sst [smem:[#allocation13_spill]] %s1160_s24  ;;  %s29_s28 = sadd.s32 1, %s1156_s23 }
   0xb   : > { %s32_s29 = sadd.s32 1, %s1160_s24  ;;  %p30_p0 = scmp.ge.s32.totalorder %s29_s28, 2 }
   0xc   : > { %s36_s30 = ssub.s32 1, %s1160_s24  ;;  %s43_s6 = sadd.s32 1, %s1144_s20 }
   0xd   : > { %s1276_s5 = smul.u32 %s1156_s23, %s36_s30  ;;  %s1555_s28 = smov (%p30_p0, %s29_s28), 0 }
   0xe   : > { %1532 = sst [smem:[#allocation14_spill]] %s1555_s28  ;;  %s1557_s29 = smov (!%p30_p0, %s32_s29), %s1160_s24 }
   0xf   : > { %p50_p1 = scmp.ne.s32.totalorder %s1144_s20, %s1140_s19  ;;  %p51_p2 = scmp.eq.s32.totalorder %s1164_s25, 0 }
  0x10   : > { %p34_p3 = scmp.ge.s32.totalorder %s1557_s29, 2  ;;  %p56_p4 = scmp.ne.s32.totalorder %s1140_s19, %s1136_s18 }
  0x11   : > { %p1286_p5 = por %p51_p2, %p50_p1  ;;  %p57_p6 = scmp.eq.s32.totalorder %s819_s26, 0 }
  0x12   : > { %s1559_s29 = smov (%p34_p3, %s1557_s29), 0  ;;  %s129_s9 = smul.u32 %s1156_s23, %s1160_s24 }
  0x13   : > { %1534 = sst [smem:[#allocation15_spill]] %s1559_s29  ;;  %p1292_p7 = por %p57_p6, %p56_p4 }
  0x14   : > { %s38_s10 = ssub.s32 1, %s1559_s29  ;;  %s130_s11 = smul.u32 %s1559_s29, %s1555_s28 }
  0x15   : > { %s39_s12 = smul.u32 %s38_s10, %s1555_s28  ;;  %s134_s13 = sadd.s32 1, %s1132_s17 }
  0x16   : > { %s131_s14 = ssub.s32 %s129_s9, %s130_s11  ;;  %p144_p8 = scmp.ne.s32.totalorder %s1132_s17, %s1128_s16 }
  0x17   : > { %s40_s18 = ssub.s32 %s1276_s5, %s39_s12  ;;  %p132_p9 = scmp.eq.s32.totalorder %s131_s14, 0 }
  0x18   : > { %p41_p10 = scmp.eq.s32.totalorder %s40_s18, 0  ;;  %p145_p11 = scmp.eq.s32.totalorder %s819_s26, 3 }
  0x19   : > { %s1307_s30 = scalar_select %p132_p9, %s1132_s17, %s134_s13  }
  0x1a   : > { %s1310_s27 = scalar_select %p41_p10, %s1144_s20, %s43_s6  }
  0x1b   : > { %p1312_p12 = por %p145_p11, %p144_p8  ;;  %p150_p13 = scmp.ne.s32.totalorder %s1128_s16, %s1124_s15 }
  0x1c   : > { %1536 = sst [smem:[#allocation16_spill]] %s1310_s27  ;;  %s1538_s10 = sadd.s32 4294967294, %s1164_s25  }
  0x1d   : > { %p151_p0 = scmp.eq.s32.totalorder %s1538_s10, 3  ;;  %p894_p1 = scmp.lt.s32.totalorder %s1164_s25, 4 }
  0x1e   : > { %s180_s9 = sand.u32 1, %s1144_s20   ;;  %s880_s6 = smul.u32 192, %s1276_s5 }
  0x1f   : > { %p1322_p2 = por %p151_p0, %p150_p13  ;;  %s879_s12 = smul.u32 12, %s180_s9 }
  0x20   : > { %p1328_p3 = pnand %p894_p1, %p1286_p5  ;;  %p824_p4 = scmp.ge.s32.totalorder %s1164_s25, 1 }
  0x21   : > { %s1539_s11 = scalar_select %p1322_p2, 1, 0 }
  0x22   : > { %s192_s18 = scalar_lea.hbm %s1521_s0, %s880_s6  ;;  %s184_s10 = scalar_lea.vmem [#allocation6], %s879_s12 }
  0x23   : > { %s194_s29 = sshll.u32 %s184_s10, 4  ;;  %p199_p6 = scmp.lt.s32.totalorder %s1164_s25, 5  ;;  %s195_s29 = int_to_ptr.vmem [resolvable:$true] %s194_s29 }
  0x24   : > { %s181_s28 = scalar_lea.sflag [#allocation7], %s180_s9  ;;  %p1018_p8 = pneg %p1328_p3 }
  0x25   : > { %s1029_s23 = scalar_lea.vmem %s195_s29, 192  ;;  %s1166_s7 = smov [#allocation6]  }
  0x26   : > { %p1030_p9 = scmp.ne.s32.totalorder %s195_s29, %s1029_s23  ;;  %s1034_s27 = sshll.u32 %s1166_s7, 4  ;;  %s1035_s27 = int_to_ptr.vmem [resolvable:$false] %s1034_s27 }
  0x27   : > { %s1036_s5 = scalar_lea.vmem %s1035_s27, 384  ;;  %p1037_p11 = scmp.lt.s32.totalorder %s195_s29, %s1035_s27 }
  0x28   : > { %p1032_p5 = pnand %p1030_p9, %p1018_p8  ;;  %p1038_p13 = scmp.lt.s32.totalorder %s1036_s5, %s1029_s23 }
  0x2a   : > { %p1033_p10 = pneg %p1032_p5  ;;  %p1039_p0 = por %p1038_p13, %p1037_p11 }
  0x2c   : > { %p1040_p1 = pnand %p1039_p0, %p1033_p10 }
  0x2e   : > { %1043 = shalt.err (!%p1040_p1)
}
  0x2f   : > { %889 = dma.hbm_to_vmem [thread:$0]  (!%p1328_p3), %s192_s18, 192, %s195_s29, %s181_s28  }
  0x30   : > { %p200_p2 = pnand %p824_p4, %p199_p6 }
  0x31   : > { %s205_s9 = sand.u32 (!%p200_p2), 1, %s1140_s19  }
  0x32   : > { %203 = sbr.rel (%p200_p2) target bundleno = 1046 (0x416), region = 36  ;;  %s206_s6 = scalar_lea.sflag (!%p200_p2), [#allocation7], %s205_s9 }
  0x33   : > { %s881_s12 = smul.u32 (!%p200_p2), 12, %s205_s9 }
  0x35   : > { %s1347_s13 = scalar_lea.vmem (!%p200_p2), [#allocation6], %s881_s12 }
  0x37   : > { %1115 = dma.done.wait (%p1292_p7), %s206_s6, 192  }
  0x38   : > { %1117 = vsyncadd (%p1292_p7), %s206_s6, 4294967104  ;;  %s231_s23 = sand.u32 1, %s1128_s16   ;;  %p826_p2 = scmp.ne.s32.totalorder %s1152_s22, 0 }
  0x39   : > { %s825_s27 = sshll.u32 %s231_s23, 4  ;;  %s1167_s29 = smov (!%p826_p2), 90  }
  0x3a   : > { %s1356_s28 = scalar_lea.vmem [#allocation9], %s825_s27  ;;  %241 = sbr.rel (%p826_p2) target bundleno = 559 (0x22f), region = 44 }
  0x3b   : > { %s1168_s8 = smov (!%p826_p2), 92   ;;  %s1170_s26 = smov (!%p826_p2), 91  }
  0x3c   : > { %s1171_s14 = smov (!%p826_p2), 109   ;;  %s1172_s18 = smov (!%p826_p2), 108  }
  0x3d   : > { %s1173_s10 = smov (!%p826_p2), 126   ;;  %s1174_s7 = smov (!%p826_p2), 110  }
  0x3e   : > { %s1177_s5 = smov (!%p826_p2), 127   ;;  %s856_s6 = sshll.u32 (!%p826_p2), %s1148_s21, 4 }
  0x3f   : > { %v1360_v0 = vld [vmem:[%s1347_s13] sm:$0xff]  ;;  %v368_v1 = vld [vmem:[%s1347_s13 + $0x8] sm:$0xf]  ;;  %v1169_v4 = vmov 0.0   ;;  %vm245_vm0 = vcmask 257024   ;;  %vm1175_vm1 = vmmov 0  }
  0x40   : > { %371 = vrot.lane.b32.xlu0 %v1360_v0, %s1167_s29  ;;  %337 = vrot.lane.b32.xlu1 %v1360_v0, %s1168_s8  ;;  %v334_v2 = vld [vmem:[%s1347_s13 + $0x8] sm:$0xf]  ;;  %v1176_v11 = vmov 0   ;;  %vm378_vm2 = vcmask 736256   ;;  %vm257_vm3 = vcmask 1043456   ;;  %vm344_vm4 = vcmask 752640  }
  0x41   : > { %v351_v3 = vld [vmem:[%s1347_s13 + $0x8] sm:$0xf]  ;;  %865 = vmatprep.subr.bf16.mxu1 %v1169_v4  ;;  %875 = vmatprep.mubr.msk.bf16.mxu1 %vm1175_vm1, %v1169_v4  ;;  %vm361_vm5 = vcmask 744448   ;;  %vm310_vm6 = vcmask 891904   ;;  %vm327_vm7 = vcmask 883712   ;;  %vm276_vm8 = vcmask 1031168  }
  0x42   : > { %v300_v5 = vld [vmem:[%s1347_s13 + $0x8] sm:$0xf]  ;;  %521 = vmatprep.mubr.bf16.mxu0 %v1176_v11  ;;  %vm293_vm9 = vcmask 900096   ;;  %vm259_vm10 = vcmask 1039360   ;;  %vm475_vm11 = vcmask 588800   ;;  %vm573_vm12 = vcmask 130048  }
  0x43   : > { %v317_v6 = vld [vmem:[%s1347_s13 + $0x8] sm:$0xf]  ;;  %s1178_s27 = smov 100   ;;  %s1185_s9 = smov 116   ;;  %vm579_vm13 = vcmask 261248   ;;  %vm584_vm14 = vcmask 392448  }
  0x44   : > { %373 = vrot.lane.b32.xlu0 %v368_v1, %s1167_s29  ;;  %339 = vrot.lane.b32.xlu1 %v334_v2, %s1168_s8  ;;  %v243_v7 = vld [vmem:[%s1347_s13 + $0x8] sm:$0xf]  ;;  %s1179_s29 = smov 124   ;;  %s1180_s8 = smov 114   ;;  %vm589_vm15 = vcmask 523648   ;;  %vm599_vm1 = vcmask 786048  }
  0x45   : > { %246 = vst.msk [vmem:[#allocation3 + $0x8] sm:$0xf] %vm245_vm0, %v243_v7  ;;  %v266_v8 = vld [vmem:[%s1347_s13 + $0x8] sm:$0xf]  ;;  %s1186_s12 = smov 106  }
  0x46   : > { %v283_v9 = vld [vmem:[%s1347_s13 + $0x8] sm:$0xf] }
  0x47   : > { %v248_v10 = vld [vmem:[%s1347_s13 + $0x8] sm:$0xf]  ;;  %s1419_s13 = scalar_lea.vmem [#allocation2], %s856_s6  ;;  %s1187_s6 = smov 104  }
  0x48   : > { %354 = vrot.lane.b32.xlu0 %v1360_v0, %s1170_s26  ;;  %356 = vrot.lane.b32.xlu1 %v351_v3, %s1170_s26  ;;  %s1181_s26 = smov 122  }
  0x4c   : > { %305 = vrot.lane.b32.xlu1 %v300_v5, %s1171_s14  ;;  %303 = vrot.lane.b32.xlu0 %v1360_v0, %s1171_s14  ;;  %s1182_s14 = smov 112  }
  0x50   : > { %322 = vrot.lane.b32.xlu1 %v317_v6, %s1172_s18  ;;  %320 = vrot.lane.b32.xlu0 %v1360_v0, %s1172_s18 }
  0x54   : > { %271 = vrot.lane.b32.xlu1 %v266_v8, %s1173_s10  ;;  %269 = vrot.lane.b32.xlu0 %v1360_v0, %s1173_s10 }
  0x58   : > { %288 = vrot.lane.b32.xlu1 %v283_v9, %s1174_s7  ;;  %286 = vrot.lane.b32.xlu0 %v1360_v0, %s1174_s7 }
  0x5c   : > { %253 = vrot.lane.b32.xlu1 %v248_v10, %s1177_s5  ;;  %251 = vrot.lane.b32.xlu0 %v1360_v0, %s1177_s5  ;;  %s1184_s5 = smov 118  }
  0xb2   : > { %v372_v12 = vpop.permute.xlu0 %371  ;;  %v338_v13 = vpop.permute.xlu1 %337 }
  0xb3   : > { %v375_v14 = vrot.slane %v372_v12, 4  ;;  %v341_v17 = vrot.slane %v338_v13, 4 }
  0xb6   : > { %v374_v15 = vpop.permute.xlu0 %373  ;;  %v340_v16 = vpop.permute.xlu1 %339 }
  0xb7   : > { %v376_v18 = vrot.slane %v374_v15, 4  ;;  %383 = vst.msk [vmem:[#allocation3 + $0x68] sm:$0xf] %vm245_vm0, %v374_v15  ;;  %v342_v19 = vrot.slane %v340_v16, 4  ;;  %349 = vst.msk [vmem:[#allocation3 + $0x50] sm:$0xf] %vm245_vm0, %v340_v16 }
  0xb9   : > { %v377_v20 = vsel %vm257_vm3, %v375_v14, %v376_v18  ;;  %v343_v21 = vsel %vm257_vm3, %v341_v17, %v342_v19  ;;  %v384_v14 = vld [vmem:[%s1522_s1] sm:$0xf] }
  0xba   : > { %v379_v22 = vsel %vm378_vm2, %v372_v12, %v377_v20  ;;  %v345_v23 = vsel %vm344_vm4, %v338_v13, %v343_v21  ;;  %v355_v24 = vpop.permute.xlu0 %354  ;;  %v357_v25 = vpop.permute.xlu1 %356  ;;  %vm604_vm2 = vcmask 917248   ;;  %vm614_vm4 = vcmask 1048448  }
  0xbb   : > { %v358_v26 = vrot.slane %v355_v24, 4  ;;  %v359_v27 = vrot.slane %v357_v25, 4  ;;  %366 = vst.msk [vmem:[#allocation3 + $0x5c] sm:$0xf] %vm245_vm0, %v357_v25  ;;  %v840_v28 = vcombine.high %v379_v22, %v379_v22  ;;  %v839_v29 = vcombine.low %v379_v22, %v379_v22 }
  0xbd   : > { %v360_v30 = vsel %vm257_vm3, %v358_v26, %v359_v27  ;;  %842 = vmatprep.subr.msk.bf16.mxu0 %vm257_vm3, %v840_v28  ;;  %v481_v31 = vsel %vm257_vm3, %v839_v29, 0 }
  0xbe   : > { %v362_v32 = vsel %vm361_vm5, %v355_v24, %v360_v30  ;;  %v306_v33 = vpop.permute.xlu1 %305  ;;  %v304_v34 = vpop.permute.xlu0 %303  ;;  %v1008_v35 = vld [vmem:[#allocation3 + $0x68] ss:$0 sps:$4 sm:$0xff]   ;;  %496 = vmatpush1.bf16.msra.mxu0 %v481_v31  ;;  %vm645_vm5 = vcmask 818176  }
  0xbf   : > { %v308_v36 = vrot.slane %v306_v33, 4  ;;  %315 = vst.msk [vmem:[#allocation3 + $0x38] sm:$0xf] %vm245_vm0, %v306_v33  ;;  %v307_v37 = vrot.slane %v304_v34, 4  ;;  %v837_v38 = vcombine.high %v345_v23, %v362_v32  ;;  %v836_v39 = vcombine.low %v345_v23, %v362_v32 }
  0xc0   : > { %v487_v40 = vsel %vm257_vm3, %v1008_v35, 0 }
  0xc1   : > { %v309_v41 = vsel %vm257_vm3, %v307_v37, %v308_v36  ;;  %866 = vmatpush3.bf16.msra.mxu1 %v487_v40  ;;  %497 = vmatprep.subr.bf16.mxu0 %v837_v38 }
  0xc2   : > { %v311_v42 = vsel %vm310_vm6, %v304_v34, %v309_v41  ;;  %v323_v43 = vpop.permute.xlu1 %322  ;;  %v321_v44 = vpop.permute.xlu0 %320  ;;  %867 = vmatprep.subr.bf16.mxu1 %v1169_v4  ;;  %v1009_v45 = vld [vmem:[#allocation3 + $0x50] ss:$12 sps:$4 sm:$0xff]   ;;  %498 = vmatpush1.bf16.msra.mxu0 %v836_v39 }
  0xc3   : > { %v325_v46 = vrot.slane %v323_v43, 4  ;;  %332 = vst.msk [vmem:[#allocation3 + $0x44] sm:$0xf] %vm245_vm0, %v323_v43  ;;  %v324_v47 = vrot.slane %v321_v44, 4 }
  0xc5   : > { %v326_v48 = vsel %vm257_vm3, %v324_v47, %v325_v46  ;;  %868 = vmatpush3.bf16.msra.mxu1 %v1009_v45 }
  0xc6   : > { %v328_v49 = vsel %vm327_vm7, %v321_v44, %v326_v48  ;;  %v272_v50 = vpop.permute.xlu1 %271  ;;  %v270_v51 = vpop.permute.xlu0 %269  ;;  %869 = vmatprep.subr.bf16.mxu1 %v1169_v4 }
  0xc7   : > { %v274_v52 = vrot.slane %v272_v50, 4  ;;  %281 = vst.msk [vmem:[#allocation3 + $0x20] sm:$0xf] %vm245_vm0, %v272_v50  ;;  %v273_v53 = vrot.slane %v270_v51, 4  ;;  %v834_v54 = vcombine.high %v311_v42, %v328_v49  ;;  %v833_v55 = vcombine.low %v311_v42, %v328_v49 }
  0xc9   : > { %v275_v56 = vsel %vm257_vm3, %v273_v53, %v274_v52  ;;  %499 = vmatprep.subr.bf16.mxu0 %v834_v54 }
  0xca   : > { %v277_v57 = vsel %vm276_vm8, %v270_v51, %v275_v56  ;;  %v289_v58 = vpop.permute.xlu1 %288  ;;  %v287_v59 = vpop.permute.xlu0 %286  ;;  %v1010_v60 = vld [vmem:[#allocation3 + $0x38] ss:$12 sps:$4 sm:$0xff]   ;;  %500 = vmatpush1.bf16.msra.mxu0 %v833_v55 }
  0xcb   : > { %v291_v61 = vrot.slane %v289_v58, 4  ;;  %298 = vst.msk [vmem:[#allocation3 + $0x2c] sm:$0xf] %vm245_vm0, %v289_v58  ;;  %v290_v62 = vrot.slane %v287_v59, 4  ;;  %870 = vmatpush3.bf16.msra.mxu1 %v1010_v60 }
  0xcc   : > { %871 = vmatprep.subr.bf16.mxu1 %v1169_v4 }
  0xcd   : > { %v292_v63 = vsel %vm257_vm3, %v290_v62, %v291_v61 }
  0xce   : > { %v294_v1 = vsel %vm293_vm9, %v287_v59, %v292_v63  ;;  %v254_v2 = vpop.permute.xlu1 %253  ;;  %v252_v3 = vpop.permute.xlu0 %251 }
  0xcf   : > { %v256_v5 = vrot.slane %v254_v2, 4  ;;  %264 = vst.msk [vmem:[#allocation3 + $0x14] sm:$0xf] %vm245_vm0, %v254_v2  ;;  %v255_v6 = vrot.slane %v252_v3, 4  ;;  %v831_v7 = vcombine.high %v277_v57, %v294_v1  ;;  %v830_v8 = vcombine.low %v277_v57, %v294_v1 }
  0xd0   : > { %vm594_vm0 = vcmask 654848  }
  0xd1   : > { %v258_v9 = vsel %vm257_vm3, %v255_v6, %v256_v5  ;;  %501 = vmatprep.subr.bf16.mxu0 %v831_v7  ;;  %vm611_vm3 = vcmask 932864  }
  0xd2   : > { %v260_v10 = vsel %vm259_vm10, %v252_v3, %v258_v9  ;;  %v1011_v11 = vld [vmem:[#allocation3 + $0x20] ss:$12 sps:$4 sm:$0xff]   ;;  %502 = vmatpush1.bf16.msra.mxu0 %v830_v8 }
  0xd3   : > { %v828_v12 = vcombine.high %v1360_v0, %v260_v10  ;;  %v827_v13 = vcombine.low %v1360_v0, %v260_v10  ;;  %872 = vmatpush3.bf16.msra.mxu1 %v1011_v11 }
  0xd4   : > { %873 = vmatprep.subr.bf16.mxu1 %v1169_v4 }
  0xd5   : > { %503 = vmatprep.subr.bf16.mxu0 %v828_v12 }
  0xd6   : > { %v1012_v15 = vld [vmem:[#allocation3 + $0x8] ss:$12 sps:$4 sm:$0xff]   ;;  %504 = vmatpush1.bf16.msra.mxu0 %v827_v13 }
  0xd7   : > { %874 = vmatpush3.bf16.msra.mxu1 %v1012_v15 }
  0xd9   : > { %843 = vmatmul.mubr.msk.bf16.vlgmr.msra.gmra.mxu0 %vm475_vm11, %v384_v14 }
  0xda   : > { %876 = vmatmul.mubr.msk.bf16.vlgmr.msra.gmra.mxu1 %vm475_vm11, %v384_v14 }
 0x199   : > { %v523_v16 = vpop.f32.mrf.mxu0 }
 0x19a   : > { %576 = vrot.lane.b32.xlu1 %v523_v16, %s1173_s10  ;;  %574 = vst.msk [vmem:[%s1419_s13] sm:$0xff] %vm573_vm12, %v523_v16  ;;  %v564_v0 = vpop.f32.mrf.mxu1  ;;  %s1183_s10 = smov 120  }
 0x19b   : > { %v525_v4 = vpop.f32.mrf.mxu0  ;;  %643 = vrot.lane.b32.xlu0 %v564_v0, %s1178_s27 }
 0x19c   : > { %v877_v17 = vpop.f32.mrf.mxu1 }
 0x19d   : > { %v527_v18 = vpop.f32.mrf.mxu0 }
 0x19e   : > { %581 = vrot.lane.b32.xlu1 %v523_v16, %s1179_s29  ;;  %v567_v19 = vpop.f32.mrf.mxu1  ;;  %s1188_s29 = smov 102  }
 0x19f   : > { %v528_v20 = vpop.f32.mrf.mxu0  ;;  %607 = vrot.lane.b32.xlu0 %v523_v16, %s1180_s8 }
 0x1a0   : > { %v878_v21 = vpop.f32.mrf.mxu1 }
 0x1a2   : > { %586 = vrot.lane.b32.xlu1 %v523_v16, %s1181_s26  ;;  %s1189_s26 = smov 98  }
 0x1a3   : > { %616 = vrot.lane.b32.xlu0 %v525_v4, %s1182_s14 }
 0x1a6   : > { %591 = vrot.lane.b32.xlu1 %v523_v16, %s1183_s10 }
 0x1a7   : > { %620 = vrot.lane.b32.xlu0 %v525_v4, %s1174_s7 }
 0x1aa   : > { %596 = vrot.lane.b32.xlu1 %v523_v16, %s1184_s5 }
 0x1ab   : > { %624 = vrot.lane.b32.xlu0 %v525_v4, %s1172_s18 }
 0x1ae   : > { %601 = vrot.lane.b32.xlu1 %v523_v16, %s1185_s9 }
 0x1af   : > { %628 = vrot.lane.b32.xlu0 %v525_v4, %s1186_s12 }
 0x1b2   : > { %641 = vrot.lane.b32.xlu1 %v525_v4, %s1178_s27 }
 0x1b3   : > { %632 = vrot.lane.b32.xlu0 %v525_v4, %s1187_s6 }
 0x1b6   : > { %609 = vrot.lane.b32.xlu1 %v525_v4, %s1180_s8 }
 0x1b7   : > { %636 = vrot.lane.b32.xlu0 %v525_v4, %s1188_s29 }
 0x1bb   : > { %649 = vrot.lane.b32.xlu0 %v564_v0, %s1189_s26 }
 0x20c   : > { %v577_v22 = vpop.permute.xlu1 %576 }
 0x20d   : > { %580 = vst.msk [vmem:[%s1419_s13] sm:$0xff] %vm579_vm13, %v577_v22  ;;  %v644_v23 = vpop.permute.xlu0 %643 }
 0x210   : > { %v582_v24 = vpop.permute.xlu1 %581 }
 0x211   : > { %585 = vst.msk [vmem:[%s1419_s13] sm:$0xff] %vm584_vm14, %v582_v24  ;;  %v608_v25 = vpop.permute.xlu0 %607 }
 0x214   : > { %v587_v26 = vpop.permute.xlu1 %586 }
 0x215   : > { %590 = vst.msk [vmem:[%s1419_s13] sm:$0xff] %vm589_vm15, %v587_v26  ;;  %v617_v27 = vpop.permute.xlu0 %616 }
 0x216   : > { %619 = vst.msk [vmem:[%s1419_s13 + $0x8] sm:$0xff] %vm573_vm12, %v617_v27 }
 0x218   : > { %v592_v28 = vpop.permute.xlu1 %591 }
 0x219   : > { %595 = vst.msk [vmem:[%s1419_s13] sm:$0xff] %vm594_vm0, %v592_v28  ;;  %v621_v29 = vpop.permute.xlu0 %620 }
 0x21a   : > { %623 = vst.msk [vmem:[%s1419_s13 + $0x8] sm:$0xff] %vm579_vm13, %v621_v29 }
 0x21c   : > { %v597_v30 = vpop.permute.xlu1 %596 }
 0x21d   : > { %600 = vst.msk [vmem:[%s1419_s13] sm:$0xff] %vm599_vm1, %v597_v30  ;;  %v625_v31 = vpop.permute.xlu0 %624 }
 0x21e   : > { %627 = vst.msk [vmem:[%s1419_s13 + $0x8] sm:$0xff] %vm584_vm14, %v625_v31 }
 0x220   : > { %v602_v32 = vpop.permute.xlu1 %601 }
 0x221   : > { %605 = vst.msk [vmem:[%s1419_s13] sm:$0xff] %vm604_vm2, %v602_v32  ;;  %v629_v33 = vpop.permute.xlu0 %628 }
 0x222   : > { %631 = vst.msk [vmem:[%s1419_s13 + $0x8] sm:$0xff] %vm589_vm15, %v629_v33 }
 0x224   : > { %v642_v34 = vpop.permute.xlu1 %641 }
 0x225   : > { %v633_v35 = vpop.permute.xlu0 %632  ;;  %v646_v39 = vsel %vm645_vm5, %v642_v34, %v644_v23 }
 0x226   : > { %635 = vst.msk [vmem:[%s1419_s13 + $0x8] sm:$0xff] %vm594_vm0, %v633_v35 }
 0x228   : > { %v610_v36 = vpop.permute.xlu1 %609 }
 0x229   : > { %v612_v37 = vsel %vm611_vm3, %v608_v25, %v610_v36  ;;  %v637_v38 = vpop.permute.xlu0 %636 }
 0x22a   : > { %615 = vst.msk [vmem:[%s1419_s13] sm:$0xff] %vm614_vm4, %v612_v37 }
 0x22b   : > { %639 = vst.msk [vmem:[%s1419_s13 + $0x8] sm:$0xff] %vm599_vm1, %v637_v38 }
 0x22c   : > { %648 = vst.msk [vmem:[%s1419_s13 + $0x8] sm:$0xff] %vm604_vm2, %v646_v39 }
 0x22d   : > { %v650_v40 = vpop.permute.xlu0 %649 }
 0x22e   : > { %652 = vst.msk [vmem:[%s1419_s13 + $0x8] sm:$0xff] %vm614_vm4, %v650_v40 }
 0x22f PF: > { %p847_p7 = scmp.ne.s32.totalorder %s1152_s22, 1 }
 0x230   : > { %p848_p3 = scmp.ne.s32.totalorder (!%p847_p7), %s1148_s21, 0 }
 0x231   : > { %656 = sbr.rel (%p847_p7) target bundleno = 1022 (0x3fe), region = 48 }
 0x236   : > { %660 = sbr.rel (%p848_p3) target bundleno = 888 (0x378), region = 52 }
 0x23b   : > { %v661_v41 = vld [vmem:[#allocation2] sm:$0xff]  ;;  %v662_v42 = vld [vmem:[#allocation2 + $0x8] sm:$0xff]  ;;  %v663_v43 = vld [vmem:[#allocation2 + $0x10] sm:$0xff]  ;;  %vm689_vm6 = vcmask 7168  }
 0x23c   : > { %v664_v44 = vld [vmem:[#allocation2 + $0x18] sm:$0xff]  ;;  %v665_v45 = vadd.f32 %v663_v43, %v661_v41  ;;  %v685_v1 = vld [vmem:[%s1523_s2] sm:$0xff] }
 0x23d   : > { %v666_v46 = vadd.f32 %v664_v44, %v662_v42  ;;  %v691_v5 = vld [vmem:[%s1524_s3] sm:$0xff] }
 0x23f   : > { %v667_v47 = vadd.f32 %v666_v46, %v665_v45 }
 0x241   : > { %668 = vadd.xlane.f32.xlu0 %v667_v47 }
 0x2ca   : > { %v669_v48 = vpop.xlane.xlu0 %668 }
 0x2cb   : > { %v670_v49 = vmul.f32 0.001953125, %v669_v48 }
 0x2cd   : > { %v671_v50 = vsub.f32 %v661_v41, %v670_v49  ;;  %v672_v51 = vsub.f32 %v662_v42, %v670_v49  ;;  %v673_v52 = vsub.f32 %v663_v43, %v670_v49  ;;  %v674_v53 = vsub.f32 %v664_v44, %v670_v49 }
 0x2cf   : > { %v675_v54 = vmul.f32 %v671_v50, %v671_v50  ;;  %v676_v55 = vmul.f32 %v672_v51, %v672_v51  ;;  %v677_v56 = vmul.f32 %v673_v52, %v673_v52  ;;  %v678_v57 = vmul.f32 %v674_v53, %v674_v53 }
 0x2d1   : > { %v679_v58 = vadd.f32 %v677_v56, %v675_v54  ;;  %v680_v59 = vadd.f32 %v678_v57, %v676_v55 }
 0x2d3   : > { %v681_v60 = vadd.f32 %v680_v59, %v679_v58 }
 0x2d5   : > { %682 = vadd.xlane.f32.xlu0 %v681_v60 }
 0x35e   : > { %v683_v61 = vpop.xlane.xlu0 %682 }
 0x35f   : > { %v684_v62 = vmul.f32 0.001953125, %v683_v61 }
 0x361   : > { %v686_v63 = vadd.f32 1e-05, %v684_v62 }
 0x363   : > { %1013 = vrsqrt.f32 %v686_v63 }
 0x370   : > { %v1014_v2 = vpop.eup %1013 }
 0x371   : > { %v688_v3 = vmul.f32 %v1014_v2, %v685_v1 }
 0x373   : > { %690 = vst.msk [vmem:[#allocation4] sm:$0xff] %vm689_vm6, %v688_v3  ;;  %v692_v6 = vmul.f32 %v688_v3, %v670_v49 }
 0x375   : > { %v693_v7 = vsub.f32 %v691_v5, %v692_v6 }
 0x377   : > { %694 = vst.msk [vmem:[#allocation5] sm:$0xff] %vm689_vm6, %v693_v7 }
 0x378 PF: > { %v1190_v9 = vmov 0   ;;  %s857_s8 = sshll.u32 %s1148_s21, 4 }
 0x379   : > { %1015 = vset.pattern.permute.xlu0 %v1190_v9  ;;  %s697_s14 = scalar_lea.vmem [#allocation2], %s857_s8 }
 0x37a   : > { %v700_v8 = vld [vmem:[#allocation4] sm:$0xff]  ;;  %v698_v12 = vld [vmem:[%s697_s14] sm:$0xff] }
 0x37b   : > { %703 = vperm.xlu0 %1015, %v700_v8   ;;  %v699_v13 = vld [vmem:[%s697_s14 + $0x8] sm:$0xff] }
 0x37e   : > { %v708_v10 = vld [vmem:[#allocation5] sm:$0xff] }
 0x37f   : > { %711 = vperm.xlu0 %1015, %v708_v10  }
 0x3f6   : > { %v704_v11 = vpop.permute.xlu0 %703 }
 0x3f7   : > { %v706_v14 = vmul.f32 %v704_v11, %v698_v12  ;;  %v707_v15 = vmul.f32 %v704_v11, %v699_v13 }
 0x3fa   : > { %v712_v16 = vpop.permute.xlu0 %711 }
 0x3fb   : > { %v714_v0 = vadd.f32 %v712_v16, %v706_v14  ;;  %v715_v4 = vadd.f32 %v712_v16, %v707_v15 }
 0x3fd   : > { %716 = vst [vmem:[%s1356_s28] sm:$0xff] %v714_v0  ;;  %717 = vst [vmem:[%s1356_s28 + $0x8] sm:$0xff] %v715_v4 }
 0x3fe PF: > { %s726_s10 = smul.u32 %s1148_s21, %s1152_s22  ;;  %s734_s5 = sshll.u32 %s1356_s28, 4  ;;  %s735_s5 = int_to_ptr.vmem [resolvable:$true] %s734_s5 }
 0x3ff   : > { %s719_s26 = scalar_lea.sflag [#allocation8], %s231_s23  ;;  %s1044_s18 = scalar_lea.vmem %s735_s5, 256 }
 0x400   : > { %s858_s9 = sshll.u32 %s726_s10, 8  ;;  %p1045_p4 = scmp.ne.s32.totalorder %s735_s5, %s1044_s18 }
 0x401   : > { %s732_s29 = scalar_lea.hbm %s1525_s4, %s858_s9  ;;  %s1191_s7 = smov [#allocation9]  }
 0x402   : > { %p1046_p6 = pnand %p1045_p4, %p1312_p12  ;;  %s1048_s13 = sshll.u32 %s1191_s7, 4  ;;  %s1049_s13 = int_to_ptr.vmem [resolvable:$false] %s1048_s13 }
 0x403   : > { %s1050_s27 = scalar_lea.vmem %s1049_s13, 512  ;;  %p1051_p9 = scmp.lt.s32.totalorder %s735_s5, %s1049_s13 }
 0x404   : > { %p1047_p8 = pneg %p1046_p6  ;;  %p1052_p5 = scmp.lt.s32.totalorder %s1050_s27, %s1044_s18 }
 0x406   : > { %p1053_p10 = por %p1052_p5, %p1051_p9 }
 0x408   : > { %p1054_p11 = pnand %p1053_p10, %p1047_p8 }
 0x40a   : > { %1057 = shalt.err (!%p1054_p11)
}
 0x40b   : > { %s1058_s21 = scalar_lea.hbm %s732_s29, 256  ;;  %s1062_s28 = scalar_lea.hbm %s1525_s4, 512 }
 0x40c   : > { %p1059_p13 = scmp.ne.s32.totalorder %s732_s29, %s1058_s21  ;;  %p1063_p2 = scmp.lt.s32.totalorder %s732_s29, %s1525_s4 }
 0x40d   : > { %p1064_p7 = scmp.lt.s32.totalorder %s1062_s28, %s1058_s21 }
 0x40e   : > { %p1060_p0 = pnand %p1059_p13, %p1312_p12 }
 0x40f   : > { %p1065_p3 = por %p1064_p7, %p1063_p2 }
 0x410   : > { %p1061_p1 = pneg %p1060_p0 }
 0x412   : > { %p1066_p4 = pnand %p1065_p3, %p1061_p1 }
 0x414   : > { %1069 = shalt.err (!%p1066_p4)
}
 0x415   : > { %884 = dma.vmem_to_hbm [thread:$0]  (%p1312_p12), %s735_s5, 256, %s732_s29, %s719_s26  }
 0x416 PF: > { %p895_p6 = scmp.ge.s32.totalorder %s1164_s25, 2  ;;  %s746_s10 = sand.u32 1, %s1124_s15  }
 0x417   : > { %p1541_p8 = scmp.ne.s32.totalorder %s1539_s11, 0  ;;  %s747_s9 = scalar_lea.sflag [#allocation8], %s746_s10 }
 0x419   : > { %p891_p9 = pnand %p895_p6, %p1541_p8 }
 0x41b   : > { %p892_p5 = pneg %p891_p9 }
 0x41d   : > { %1119 = dma.done.wait (%p892_p5), %s747_s9, 256  }
 0x41e   : > { %1121 = vsyncadd (%p892_p5), %s747_s9, 4294967040  ;;  %s20_s25 = sadd.s32 1, %s1164_s25   ;;  %s1542_s24 = sld [smem:[#allocation16_spill]] }
 0x41f   : > { %p17_p10 = scmp.ge.s32.totalorder %s20_s25, 6   ;;  %s1543_s21 = sld [smem:[#allocation12_spill]] }
 0x420   : > { %s1544_s22 = sld [smem:[#allocation13_spill]]  ;;  %s1547_s15 = smov %s1128_s16 }
 0x421   : > { %s1545_s23 = sld [smem:[#allocation14_spill]]  ;;  %s1548_s16 = smov %s1132_s17 }
 0x422   : > { %s1546_s5 = sld [smem:[#allocation15_spill]]  ;;  %s1549_s17 = smov %s1307_s30 }
 0x423   : > { %s1550_s18 = smov %s1140_s19  ;;  %s1551_s19 = smov %s1144_s20 }
 0x424   : > { %s1552_s20 = smov %s1542_s24  ;;  %19 = sbr.rel (!%p17_p10) target bundleno = 9 (0x9), region = 95 }
 0x428   : > { %s1553_s24 = smov %s1546_s5 }
 0x429   :  { %752 = vsyncpa [#allocation7], 1 }
 0x42a   :  { %754 = vsyncpa [#allocation7 + $0x1], 1 }
 0x42b   :  { %755 = vsyncpa [#allocation8], 1 }
 0x42c   :  { %757 = vsyncpa [#allocation8 + $0x1], 1 }

</bundles_post_ra>
